<compile_context>
chip_gen: v7x
topology: tpu7x:2x2x1
jax: 0.10.0
libtpu: 0.0.40
codegen_flags: <defaults>
</compile_context>

<pallas_src>
import functools

import jax
import jax.numpy as jnp
from jax.experimental import pallas as pl
from jax.experimental.pallas import tpu as pltpu


def _round_up(x, m):
    return (x + m - 1) // m * m


def _vmem_budget_bytes():
    """Per-generation scoped-VMEM budget.  Conservative default is v7x-safe."""
    try:
        kind = jax.devices()[0].device_kind.lower()
    except Exception:
        kind = ""
    # v5e / v6e: 128 MiB physical VMEM per TensorCore -> use ~96 MiB.
    if any(s in kind for s in ("v5 lite", "v5e", "v6 lite", "v6e", "v6")):
        return 96 * 1024 * 1024
    # v7x (and unknown): 64 MiB physical -> ~48 MiB leaves headroom for
    # Mosaic internal scratch / compiler buffers.
    return 48 * 1024 * 1024


def _pick_tk(nhid):
    """Reduction tile: prefer 256-multiples dividing nhid; else full K
    (block dim == full array dim is legal and avoids padding x along K)."""
    for c in (1024, 512, 256, 128):
        if nhid % c == 0:
            return c
    return nhid


def _pick_tn(n_pad):
    for c in (1024, 512, 256, 128):
        if n_pad % c == 0:
            return c
    return n_pad


def _pick_tm(M, pack):
    """Return (tm, m_pad).  Minimal padding for small M (single block);
    256/512 MXU-friendly tiles for large M unless padding waste > ~12.5%."""
    m_aligned = _round_up(M, pack)
    if m_aligned <= 512:
        return m_aligned, m_aligned
    for c in (512, 256, 128, 64, 32, 16, 8):
        if c % pack:
            continue
        mp = _round_up(M, c)
        if (mp - M) * 8 <= mp:          # accept <= 12.5% padded rows
            return c, mp
    return m_aligned, m_aligned          # unreachable (c == pack always accepts)


def mlp_kernel(x_ref, w_ref, b_ref, o_ref, acc_ref):
    k = pl.program_id(2)

    @pl.when(k == 0)
    def _():
        acc_ref[...] = jnp.zeros_like(acc_ref)

    acc_ref[...] += jnp.dot(
        x_ref[...], w_ref[...], preferred_element_type=jnp.float32
    )

    @pl.when(k == pl.num_programs(2) - 1)
    def _():
        o_ref[...] = (acc_ref[...] + b_ref[...]).astype(o_ref.dtype)


def prepare_params(weight, bias, compute_dtype=jnp.bfloat16):
    """One-time prep: PyTorch (nclass, nhid) weight -> (nhid, N_pad) MXU RHS layout.

    * transpose done once (outside the per-call forward path)
    * N padded to a 128 multiple -> lane-dense, unmasked output stores
    * K kept exact so activations never need per-call K padding
    * weight cast to the compute dtype (bf16 by default); bias stays f32
      (added to the f32 accumulator in the epilogue).
    """
    nclass, nhid = weight.shape
    n_pad = _round_up(nclass, 128)
    w_dtype = compute_dtype if compute_dtype is not None else weight.dtype
    w_t = (
        jnp.zeros((nhid, n_pad), w_dtype)
        .at[:, :nclass]
        .set(weight.T.astype(w_dtype))
    )
    b2d = (
        jnp.zeros((1, n_pad), jnp.float32)
        .at[0, :nclass]
        .set(bias.astype(jnp.float32))
    )
    return w_t, b2d


def mlp_forward(x, w_t, b2d, nclass, compute_dtype=jnp.bfloat16):
    """x: (M, nhid); w_t: (nhid, N_pad) from prepare_params; b2d: (1, N_pad)."""
    M, nhid = x.shape
    k_dim, n_pad = w_t.shape
    assert k_dim == nhid, "weight K dim must match x feature dim"
    out_dtype = x.dtype

    if compute_dtype is not None and x.dtype != compute_dtype:
        x = x.astype(compute_dtype)

    itemsize = jnp.dtype(x.dtype).itemsize
    pack = {4: 8, 2: 16, 1: 32}[itemsize]     # packed-sublane multiple per dtype

    tk = _pick_tk(nhid)
    tn = _pick_tn(n_pad)
    tm, m_pad = _pick_tm(M, pack)

    # v7x has 2 TensorCores: ensure >=2 parallel (M,N) blocks when legal.
    if (m_pad // tm) * (n_pad // tn) == 1:
        if tn % 256 == 0:
            tn //= 2
        elif tm % (2 * pack) == 0:
            tm //= 2

    # Pad x only along M (cheap); never re-materialize along K.
    if m_pad != M:
        x = jnp.pad(x, ((0, m_pad - M), (0, 0)))

    k_steps = nhid // tk
    grid = (m_pad // tm, n_pad // tn, k_steps)

    w_isz = jnp.dtype(w_t.dtype).itemsize
    out_isz = jnp.dtype(out_dtype).itemsize
    budget = _vmem_budget_bytes()

    def footprint(w_bufs):
        return (
            2 * tm * tk * itemsize        # x tiles (double-buffered)
            + w_bufs * tk * tn * w_isz    # weight tiles
            + 2 * tn * 4                  # bias tiles
            + 2 * tm * tn * out_isz       # output tiles
            + tm * tn * 4                 # f32 accumulator
        )

    # 3-deep weight prefetch only when the K grid is long and it fits the budget.
    w_bufs = 3 if (k_steps >= 4 and 2 * footprint(3) <= budget) else 2
    vmem_limit = int(min(budget, max(8 * 1024 * 1024, 2 * footprint(w_bufs))))

    cost = pl.CostEstimate(
        flops=2 * m_pad * nhid * n_pad,
        transcendentals=0,
        bytes_accessed=(
            grid[1] * m_pad * nhid * itemsize   # x re-streamed once per N block
            + grid[0] * nhid * n_pad * w_isz    # weight re-streamed once per M block
            + grid[0] * n_pad * 4               # bias
            + m_pad * n_pad * out_isz           # output written once
        ),
    )

    w_spec_kwargs = {}
    if w_bufs == 3:
        w_spec_kwargs["pipeline_mode"] = pl.Buffered(3)

    out_p = pl.pallas_call(
        mlp_kernel,
        out_shape=jax.ShapeDtypeStruct((m_pad, n_pad), out_dtype),
        grid_spec=pltpu.PrefetchScalarGridSpec(
            num_scalar_prefetch=0,
            grid=grid,
            in_specs=[
                pl.BlockSpec((tm, tk), lambda i, j, k: (i, k)),
                pl.BlockSpec((tk, tn), lambda i, j, k: (k, j), **w_spec_kwargs),
                pl.BlockSpec((1, tn), lambda i, j, k: (0, j)),
            ],
            out_specs=pl.BlockSpec((tm, tn), lambda i, j, k: (i, j)),
            scratch_shapes=[pltpu.VMEM((tm, tn), jnp.float32)],
        ),
        compiler_params=pltpu.CompilerParams(
            dimension_semantics=("parallel", "parallel", "arbitrary"),
            vmem_limit_bytes=vmem_limit,
        ),
        cost_estimate=cost,
    )(x, w_t, b2d)

    # Slice away M / lane padding.
    return out_p[:M, :nclass]


if __name__ == "__main__":
    nhid, nclass, batch = 32, 16, 8

    key = jax.random.PRNGKey(0)
    k_x, k_w, k_b = jax.random.split(key, 3)

    # Matches MLP.reset_parameters(): weight ~ N(0, 0.05)
    weight = 0.05 * jax.random.normal(k_w, (nclass, nhid), dtype=jnp.float32)
    # PyTorch Linear default bias init: U(-1/sqrt(nhid), 1/sqrt(nhid))
    bound = 1.0 / (nhid ** 0.5)
    bias = jax.random.uniform(
        k_b, (nclass,), dtype=jnp.float32, minval=-bound, maxval=bound
    )
    x = jax.random.normal(k_x, (batch, nhid), dtype=jnp.float32)

    # bf16 operands, f32 accumulation (MXU peak path on all generations).
    compute_dtype = jnp.bfloat16

    # One-time parameter prep (transpose + lane-dense N padding).
    w_t, b2d = prepare_params(weight, bias, compute_dtype=compute_dtype)

    fwd = jax.jit(
        functools.partial(mlp_forward, nclass=nclass, compute_dtype=compute_dtype)
    )
    out = fwd(x, w_t, b2d)
    jax.block_until_ready(out)

    assert out.shape == (batch, nclass)
    assert out.dtype == jnp.float32

    # Reference with the SAME bf16-rounded operands + f32 accumulation (tight tol).
    xb = x.astype(jnp.bfloat16).astype(jnp.float32)
    wb = weight.astype(jnp.bfloat16).astype(jnp.float32)
    ref_bf16 = jnp.dot(xb, wb.T, precision=jax.lax.Precision.HIGHEST) + bias
    assert jnp.allclose(out, ref_bf16, atol=1e-4, rtol=1e-4)

    # Full-f32 reference: only bf16 operand rounding differs (loose tol, expected).
    ref_f32 = jnp.dot(x, weight.T, precision=jax.lax.Precision.HIGHEST) + bias
    assert jnp.allclose(out, ref_f32, atol=5e-2, rtol=5e-2)

    print("KERNEL_OK")
</pallas_src>

<mosaic_0001>
module attributes {stable_mosaic.version = 11 : i64} {
  func.func @mlp_kernel(%arg0: i32, %arg1: i32, %arg2: i32, %arg3: memref<16x32xbf16, #tpu.memory_space<vmem>>, %arg4: memref<32x128xbf16, #tpu.memory_space<vmem>>, %arg5: memref<1x128xf32, #tpu.memory_space<vmem>>, %arg6: memref<16x128xf32, #tpu.memory_space<vmem>>, %arg7: memref<16x128xf32, #tpu.memory_space<vmem>>) attributes {dimension_semantics = [#tpu.dimension_semantics<parallel>, #tpu.dimension_semantics<parallel>, #tpu.dimension_semantics<arbitrary>], iteration_bounds = array<i64: 1, 1, 1>, scalar_prefetch = 0 : i64, scratch_operands = 1 : i64, tpu.core_type = #tpu.core_type<tc>, window_params = [{transform_indices = @transform_0, window_bounds = array<i64: 16, 32>}, {transform_indices = @transform_1, window_bounds = array<i64: 32, 128>}, {transform_indices = @transform_2, window_bounds = array<i64: 1, 128>}, {transform_indices = @transform_3, window_bounds = array<i64: 16, 128>}]} {
    %c0_i32 = arith.constant 0 : i32
    %0 = arith.cmpi eq, %arg2, %c0_i32 : i32
    %1 = arith.extui %0 : i1 to i32
    %c0_i32_0 = arith.constant 0 : i32
    %2 = arith.cmpi ne, %1, %c0_i32_0 : i32
    scf.if %2 {
      %cst_10 = arith.constant 0.000000e+00 : f32
      %12 = vector.broadcast %cst_10 : f32 to vector<16x128xf32>
      %c0_11 = arith.constant 0 : index
      %c0_12 = arith.constant 0 : index
      %13 = vector.load %arg7[%c0_11, %c0_12] : memref<16x128xf32, #tpu.memory_space<vmem>>, vector<16x128xf32>
      tpu.vector_store %arg7[%c0_11, %c0_12], %12 {strides = array<i32>} : memref<16x128xf32, #tpu.memory_space<vmem>>, vector<16x128xf32>,
    } else {
    }
    %c0 = arith.constant 0 : index
    %c0_1 = arith.constant 0 : index
    %3 = vector.load %arg7[%c0, %c0_1] : memref<16x128xf32, #tpu.memory_space<vmem>>, vector<16x128xf32>
    %c0_2 = arith.constant 0 : index
    %c0_3 = arith.constant 0 : index
    %4 = vector.load %arg3[%c0_2, %c0_3] : memref<16x32xbf16, #tpu.memory_space<vmem>>, vector<16x32xbf16>
    %c0_4 = arith.constant 0 : index
    %c0_5 = arith.constant 0 : index
    %5 = vector.load %arg4[%c0_4, %c0_5] : memref<32x128xbf16, #tpu.memory_space<vmem>>, vector<32x128xbf16>
    %cst = arith.constant dense<0.000000e+00> : vector<16x128xf32>
    %6 = tpu.matmul %4, %5, %cst {dimension_numbers = #tpu.dot_dimension_numbers<[1], [0], [0], [1], [0, 0, 1, 1], [], []>} : vector<16x32xbf16>, vector<32x128xbf16>, vector<16x128xf32> -> vector<16x128xf32>
    %7 = arith.addf %3, %6 : vector<16x128xf32>
    %c0_6 = arith.constant 0 : index
    %c0_7 = arith.constant 0 : index
    %8 = vector.load %arg7[%c0_6, %c0_7] : memref<16x128xf32, #tpu.memory_space<vmem>>, vector<16x128xf32>
    tpu.vector_store %arg7[%c0_6, %c0_7], %7 {strides = array<i32>} : memref<16x128xf32, #tpu.memory_space<vmem>>, vector<16x128xf32>,
    %c0_i32_8 = arith.constant 0 : i32
    %9 = arith.cmpi eq, %arg2, %c0_i32_8 : i32
    %10 = arith.extui %9 : i1 to i32
    %c0_i32_9 = arith.constant 0 : i32
    %11 = arith.cmpi ne, %10, %c0_i32_9 : i32
    scf.if %11 {
      %c0_10 = arith.constant 0 : index
      %c0_11 = arith.constant 0 : index
      %12 = vector.load %arg7[%c0_10, %c0_11] : memref<16x128xf32, #tpu.memory_space<vmem>>, vector<16x128xf32>
      %c0_12 = arith.constant 0 : index
      %c0_13 = arith.constant 0 : index
      %13 = vector.load %arg5[%c0_12, %c0_13] : memref<1x128xf32, #tpu.memory_space<vmem>>, vector<1x128xf32>
      %14 = vector.broadcast %13 : vector<1x128xf32> to vector<16x128xf32>
      %15 = arith.addf %12, %14 : vector<16x128xf32>
      %c0_14 = arith.constant 0 : index
      %c0_15 = arith.constant 0 : index
      %16 = vector.load %arg6[%c0_14, %c0_15] : memref<16x128xf32, #tpu.memory_space<vmem>>, vector<16x128xf32>
      tpu.vector_store %arg6[%c0_14, %c0_15], %15 {strides = array<i32>} : memref<16x128xf32, #tpu.memory_space<vmem>>, vector<16x128xf32>,
    } else {
    }
    return
  }
  func.func @transform_0(%arg0: i32, %arg1: i32, %arg2: i32) -> (i32, i32) {
    %c0_i32 = arith.constant 0 : i32
    return %arg0, %arg2 : i32, i32
  }
  func.func @transform_1(%arg0: i32, %arg1: i32, %arg2: i32) -> (i32, i32) {
    %c0_i32 = arith.constant 0 : i32
    return %arg2, %arg1 : i32, i32
  }
  func.func @transform_2(%arg0: i32, %arg1: i32, %arg2: i32) -> (i32, i32) {
    %c0_i32 = arith.constant 0 : i32
    %c0_i32_0 = arith.constant 0 : i32
    return %c0_i32, %arg1 : i32, i32
  }
  func.func @transform_3(%arg0: i32, %arg1: i32, %arg2: i32) -> (i32, i32) {
    %c0_i32 = arith.constant 0 : i32
    return %arg0, %arg1 : i32, i32
  }
}

</mosaic_0001>

<bundles_post_ra>
// kernel: mlp_forward.1
= control target key start
LH: loop header
LB: loop body
LE: loop exit
PB: predicated region body
PF: predicated region fallthrough
CT: control target
= control target key end

     0   :  { %v136_v0 = vmov 0.0   ;;  %vm137_vm0 = vmmov 0   ;;  %vm46_vm1 = vcmask 261120   ;;  %s176_s1 = inlined_call_operand.vmem [shape: bf16[32,128], index: 1, kind: input, shape index: {}]   ;;  %s177_s0 = inlined_call_operand.vmem [shape: bf16[16,32], index: 0, kind: input, shape index: {}]   ;;  %s178_s2 = inlined_call_operand.vmem [shape: f32[1,128], index: 2, kind: input, shape index: {}]   ;;  %s179_s3 = inlined_call_operand.vmem [shape: f32[16,128], index: 3, kind: output, shape index: {}]  }
   0x1   :  { %123 = vmatprep.subr.bf16.mxu0 %v136_v0  ;;  %v133_v1 = vld [vmem:[%s176_s1] sm:$0xff]   ;;  %127 = vmatprep.mubr.msk.bf16.mxu0 %vm137_vm0, %v136_v0  ;;  %v134_v2 = vld [vmem:[%s176_s1 + $0x8] sm:$0xff]  }
   0x2   :  { %124 = vmatpush3.bf16.msra.mxu0 %v133_v1  ;;  %v135_v3 = vld [vmem:[%s177_s0] sm:$0xff]  }
   0x3   :  { %125 = vmatprep.subr.bf16.mxu0 %v136_v0  ;;  %v119_v4 = vld [vmem:[%s178_s2] ss:$0 sm:$0xff] }
   0x6   :  { %126 = vmatpush3.bf16.msra.mxu0 %v134_v2 }
   0x9   :  { %128 = vmatmul.mubr.msk.bf16.vlgmr.msra.gmra.mrb[0].mxu0 %vm46_vm1, %v135_v3 }
  0xdc   :  { %v84_v5 = vpop.f32.mrb[0].mxu0 }
  0xdd   :  { %v107_v6 = vadd.f32 %v119_v4, %v84_v5  ;;  %v129_v7 = vpop.f32.mrb[1].mxu0 }
  0xde   :  { %v87_v8 = vpop.f32.mrb[2].mxu0 }
  0xdf   :  { %109 = vst [vmem:[%s179_s3] sm:$0xff] %v107_v6  ;;  %v108_v9 = vadd.f32 %v119_v4, %v87_v8  ;;  %v130_v10 = vpop.f32.mrb[3].mxu0 }
  0xe1   :  { %110 = vst [vmem:[%s179_s3 + $0x8] sm:$0xff] %v108_v9 }

</bundles_post_ra>
